<compile_context>
chip_gen: v6e
topology: v6e:2x2x1
jax: 0.10.0
libtpu: 0.0.40
codegen_flags: <defaults>
</compile_context>

<pallas_src>
import functools

import jax
import jax.numpy as jnp
import numpy as np
from jax import lax
from jax.experimental import pallas as pl
from jax.experimental.pallas import tpu as pltpu


def iris_kernel(xc_ref, xp_ref, w1_ref, w2_ref, wtap_ref, vec_ref, o_ref, *,
                c_mid, ksize, Wo):
    """Fused IrisBlock forward for one image (channels on sublanes, pixels on lanes).

    xc_ref  : (1, Kin, P)        conv input (space-to-depth'd for stride=2)
    xp_ref  : (1, win, c_out, P) skip input, window positions leading, channel-padded
    w1_ref  : (c_mid, Kin)       convAct weights
    w2_ref  : (c_out, c_mid)     1x1 projection weights
    wtap_ref: (ksize*ksize, c_mid, P)  depthwise weights * spatial validity masks
    vec_ref : (c_out, 4)         columns: [b1(pad0), a1(pad0), b2_eff, a2]
    o_ref   : (1, c_out, P)
    """
    Kin = w1_ref.shape[1]
    P = o_ref.shape[2]
    win = xp_ref.shape[1]
    pad = (ksize - 1) // 2

    w1 = w1_ref[...]
    w2 = w2_ref[...]
    vecs = vec_ref[...]

    # ---- convAct: pointwise conv as VPU outer-product FMA over K, then PReLU
    xc = xc_ref[0]                                        # (Kin, P)
    h = w1[:, 0:1] * xc[0:1, :]                           # (c_mid, P)
    for k in range(1, Kin):
        h = h + w1[:, k:k + 1] * xc[k:k + 1, :]
    h = h + vecs[0:c_mid, 0:1]                            # + b1
    a1 = vecs[0:c_mid, 1:2]
    h = jnp.where(h > 0, h, a1 * h)                       # PReLU(c_mid)

    # ---- depthwise kxk conv (stride 1, zero pad) via lane rolls of the
    #      flattened pixel axis; border handling is folded into wtap
    #      (wtap[tap,c,p] = wdw[c,tap] * valid_mask[tap,p]).
    acc = None
    tap = 0
    for ky in range(ksize):
        for kx in range(ksize):
            off = (ky - pad) * Wo + (kx - pad)
            shifted = h if off == 0 else pltpu.roll(h, shift=(-off) % P, axis=1)
            term = shifted * wtap_ref[tap]
            acc = term if acc is None else acc + term
            tap += 1

    # ---- 1x1 projection conv (depthwise bias already folded into b2_eff)
    y = w2[:, 0:1] * acc[0:1, :]                          # (c_out, P)
    for m in range(1, c_mid):
        y = y + w2[:, m:m + 1] * acc[m:m + 1, :]
    y = y + vecs[:, 2:3]                                  # + b2_eff

    # ---- skip branch: maxpool over leading window axis (full-plane VPU max),
    #      already zero channel-padded to c_out in the wrapper.
    skip = xp_ref[0, 0]
    for w in range(1, win):
        skip = jnp.maximum(skip, xp_ref[0, w])
    y = y + skip

    # ---- final PReLU(c_out), lane-dense store
    a2 = vecs[:, 3:4]
    y = jnp.where(y > 0, y, a2 * y)
    o_ref[0] = y.astype(o_ref.dtype)


def iris_block_pallas(x_nchw, params, *, in_channels, out_channels,
                      kernel_size=3, stride=1):
    N, C, H, W = x_nchw.shape
    assert C == in_channels
    assert out_channels >= in_channels, "IrisBlock channel-pad assumes c_out >= c_in"
    c_mid = out_channels // 2
    s = stride
    Ho, Wo = H // s, W // s
    P_real = Ho * Wo
    P = ((P_real + 127) // 128) * 128         # pad pixel axis to lane-dense width
    lane_pad = P - P_real
    win = s * s
    Kin = win * in_channels
    pad = (kernel_size - 1) // 2
    f32 = jnp.float32

    x = x_nchw.astype(f32)

    # ---- input plumbing (XLA reshapes / transposes only) --------------------
    if s == 2:
        xr = x[:, :, :2 * Ho, :2 * Wo].reshape(N, C, Ho, 2, Wo, 2)
        # conv view: rows ordered (c, ky, kx) -> matches w1.reshape(c_mid, -1)
        xc = xr.transpose(0, 1, 3, 5, 2, 4).reshape(N, Kin, P_real)
        # maxpool view: 2x2 window positions on a leading axis
        xp = xr.transpose(0, 3, 5, 1, 2, 4).reshape(N, win, C, P_real)
    else:
        xc = x.reshape(N, C, P_real)
        xp = xc.reshape(N, 1, C, P_real)
    xc = jnp.pad(xc, ((0, 0), (0, 0), (0, lane_pad)))
    # zero channel-pad + lane-pad the skip branch in the wrapper
    xp = jnp.pad(xp, ((0, 0), (0, 0),
                      (0, out_channels - in_channels), (0, lane_pad)))

    # ---- parameter plumbing --------------------------------------------------
    w1 = params["w1"].reshape(c_mid, Kin).astype(f32)          # (c_mid, c_in*s*s)
    w2 = params["w2"][:, :, 0, 0].astype(f32)                  # (c_out, c_mid)
    # fold depthwise bias through the 1x1 conv:  b2_eff = b2 + W2 @ bdw
    b2_eff = params["b2"].astype(f32) + w2 @ params["bdw"].astype(f32)

    # pack per-channel vectors into one small (c_out, 4) tile
    def padv(v):
        return jnp.pad(v.astype(f32), (0, out_channels - c_mid))
    vecs = jnp.stack([padv(params["b1"]), padv(params["a1"]),
                      b2_eff, params["a2"].astype(f32)], axis=1)   # (c_out, 4)

    # depthwise taps: per-(tap, channel) weight times spatial validity mask
    pidx = np.arange(P)
    ii = pidx // Wo
    jj = pidx % Wo
    in_img = pidx < P_real
    masks = []
    for ky in range(kernel_size):
        for kx in range(kernel_size):
            dy, dx = ky - pad, kx - pad
            valid = (in_img & (ii + dy >= 0) & (ii + dy < Ho) &
                     (jj + dx >= 0) & (jj + dx < Wo)).astype(np.float32)
            masks.append(valid)
    masks = jnp.asarray(np.stack(masks))                             # (k*k, P)
    wdw = params["wdw"][:, 0, :, :].reshape(c_mid, kernel_size * kernel_size)
    wtap = wdw.T.astype(f32)[:, :, None] * masks[:, None, :]        # (k*k, c_mid, P)

    kern = functools.partial(iris_kernel, c_mid=c_mid, ksize=kernel_size, Wo=Wo)

    out = pl.pallas_call(
        kern,
        out_shape=jax.ShapeDtypeStruct((N, out_channels, P), f32),
        grid=(N,),
        in_specs=[
            pl.BlockSpec((1, Kin, P), lambda n: (n, 0, 0)),
            pl.BlockSpec((1, win, out_channels, P), lambda n: (n, 0, 0, 0)),
            pl.BlockSpec((c_mid, Kin), lambda n: (0, 0)),
            pl.BlockSpec((out_channels, c_mid), lambda n: (0, 0)),
            pl.BlockSpec((kernel_size * kernel_size, c_mid, P), lambda n: (0, 0, 0)),
            pl.BlockSpec((out_channels, 4), lambda n: (0, 0)),
        ],
        out_specs=pl.BlockSpec((1, out_channels, P), lambda n: (n, 0, 0)),
        compiler_params=pltpu.CompilerParams(dimension_semantics=("parallel",)),
    )(xc, xp, w1, w2, wtap, vecs)

    # slice off the lane padding and reshape straight back to NCHW
    return out[:, :, :P_real].reshape(N, out_channels, Ho, Wo)


def iris_block_ref(x, p, *, stride, ksize):
    """Pure-JAX (XLA) reference mirroring the PyTorch forward exactly (NCHW)."""
    c_mid = p["b1"].shape[0]
    c_out = p["b2"].shape[0]

    def prelu(v, a):
        return jnp.where(v > 0, v, a.reshape(1, -1, 1, 1) * v)

    dn = ("NCHW", "OIHW", "NCHW")
    h = lax.conv_general_dilated(x, p["w1"], (stride, stride), "VALID",
                                 dimension_numbers=dn)
    h = prelu(h + p["b1"].reshape(1, -1, 1, 1), p["a1"])
    pad = (ksize - 1) // 2
    hd = lax.conv_general_dilated(h, p["wdw"], (1, 1), [(pad, pad), (pad, pad)],
                                  dimension_numbers=dn, feature_group_count=c_mid)
    hd = hd + p["bdw"].reshape(1, -1, 1, 1)
    y = lax.conv_general_dilated(hd, p["w2"], (1, 1), "VALID", dimension_numbers=dn)
    y = y + p["b2"].reshape(1, -1, 1, 1)
    xs = x
    if stride == 2:
        xs = lax.reduce_window(x, -jnp.inf, lax.max, (1, 1, 2, 2), (1, 1, 2, 2), "VALID")
    cpad = c_out - x.shape[1]
    if cpad > 0:
        xs = jnp.pad(xs, ((0, 0), (0, cpad), (0, 0), (0, 0)))
    return prelu(y + xs, p["a2"])


def init_params(key, in_channels, out_channels, kernel_size, stride):
    """Deterministic synthetic parameters, shaped like the PyTorch module's."""
    c_mid = out_channels // 2
    ks = jax.random.split(key, 8)

    def rnd(k, shape, scale=0.1):
        return (scale * jax.random.normal(k, shape)).astype(jnp.float32)

    return dict(
        w1=rnd(ks[0], (c_mid, in_channels, stride, stride)),           # convAct conv
        b1=rnd(ks[1], (c_mid,)),
        a1=(0.25 + rnd(ks[2], (c_mid,), 0.05)),                        # PReLU(c_mid)
        wdw=rnd(ks[3], (c_mid, 1, kernel_size, kernel_size)),          # depthwise conv
        bdw=rnd(ks[4], (c_mid,)),
        w2=rnd(ks[5], (out_channels, c_mid, 1, 1)),                    # 1x1 conv
        b2=rnd(ks[6], (out_channels,)),
        a2=(0.25 + rnd(ks[7], (out_channels,), 0.05)),                 # PReLU(c_out)
    )


if __name__ == "__main__":
    key = jax.random.PRNGKey(0)
    kx, kp1, kp2 = jax.random.split(key, 3)
    x = jax.random.normal(kx, (2, 4, 16, 16), dtype=jnp.float32)       # NCHW like torch

    configs = [
        dict(in_channels=4, out_channels=8, kernel_size=3, stride=1),
        dict(in_channels=4, out_channels=8, kernel_size=3, stride=2),
    ]
    ok = True
    for cfg, kp in zip(configs, (kp1, kp2)):
        params = init_params(kp, **cfg)
        out = jax.block_until_ready(iris_block_pallas(x, params, **cfg))
        ref = iris_block_ref(x, params, stride=cfg["stride"], ksize=cfg["kernel_size"])
        if not np.allclose(np.asarray(out), np.asarray(ref), atol=5e-3, rtol=5e-3):
            ok = False
            print("mismatch (stride=%d): max_abs_err=%.3e"
                  % (cfg["stride"],
                     float(np.max(np.abs(np.asarray(out) - np.asarray(ref))))))
    if ok:
        print("KERNEL_OK")
</pallas_src>

<mosaic_0001>
module attributes {stable_mosaic.version = 11 : i64} {
  func.func @iris_kernel(%arg0: i32, %arg1: memref<1x4x256xf32, #tpu.memory_space<vmem>>, %arg2: memref<1x1x8x256xf32, #tpu.memory_space<vmem>>, %arg3: memref<4x4xf32, #tpu.memory_space<vmem>>, %arg4: memref<8x4xf32, #tpu.memory_space<vmem>>, %arg5: memref<9x4x256xf32, #tpu.memory_space<vmem>>, %arg6: memref<8x4xf32, #tpu.memory_space<vmem>>, %arg7: memref<1x8x256xf32, #tpu.memory_space<vmem>>) attributes {dimension_semantics = [#tpu.dimension_semantics<parallel>], iteration_bounds = array<i64: 2>, scalar_prefetch = 0 : i64, scratch_operands = 0 : i64, tpu.core_type = #tpu.core_type<tc>, window_params = [{transform_indices = @transform_0, window_bounds = array<i64: 1, 4, 256>}, {transform_indices = @transform_1, window_bounds = array<i64: 1, 1, 8, 256>}, {pipeline_mode = #tpu.pipeline_mode<synchronous>, transform_indices = @transform_2, window_bounds = array<i64: 4, 4>}, {pipeline_mode = #tpu.pipeline_mode<synchronous>, transform_indices = @transform_3, window_bounds = array<i64: 8, 4>}, {pipeline_mode = #tpu.pipeline_mode<synchronous>, transform_indices = @transform_4, window_bounds = array<i64: 9, 4, 256>}, {pipeline_mode = #tpu.pipeline_mode<synchronous>, transform_indices = @transform_5, window_bounds = array<i64: 8, 4>}, {transform_indices = @transform_6, window_bounds = array<i64: 1, 8, 256>}]} {
    %c0 = arith.constant 0 : index
    %c0_0 = arith.constant 0 : index
    %0 = vector.load %arg3[%c0, %c0_0] : memref<4x4xf32, #tpu.memory_space<vmem>>, vector<4x4xf32>
    %c0_1 = arith.constant 0 : index
    %c0_2 = arith.constant 0 : index
    %1 = vector.load %arg4[%c0_1, %c0_2] : memref<8x4xf32, #tpu.memory_space<vmem>>, vector<8x4xf32>
    %c0_3 = arith.constant 0 : index
    %c0_4 = arith.constant 0 : index
    %2 = vector.load %arg6[%c0_3, %c0_4] : memref<8x4xf32, #tpu.memory_space<vmem>>, vector<8x4xf32>
    %c0_5 = arith.constant 0 : index
    %c0_6 = arith.constant 0 : index
    %c0_7 = arith.constant 0 : index
    %3 = vector.load %arg1[%c0_5, %c0_6, %c0_7] : memref<1x4x256xf32, #tpu.memory_space<vmem>>, vector<1x4x256xf32>
    %4 = vector.shape_cast %3 : vector<1x4x256xf32> to vector<4x256xf32>
    %5 = vector.extract_strided_slice %0 {offsets = [0, 0], sizes = [4, 1], strides = [1, 1]} : vector<4x4xf32> to vector<4x1xf32>
    %6 = vector.extract_strided_slice %4 {offsets = [0, 0], sizes = [1, 256], strides = [1, 1]} : vector<4x256xf32> to vector<1x256xf32>
    %7 = vector.broadcast %5 : vector<4x1xf32> to vector<4x256xf32>
    %8 = vector.broadcast %6 : vector<1x256xf32> to vector<4x256xf32>
    %9 = arith.mulf %7, %8 : vector<4x256xf32>
    %10 = vector.extract_strided_slice %0 {offsets = [0, 1], sizes = [4, 1], strides = [1, 1]} : vector<4x4xf32> to vector<4x1xf32>
    %11 = vector.extract_strided_slice %4 {offsets = [1, 0], sizes = [1, 256], strides = [1, 1]} : vector<4x256xf32> to vector<1x256xf32>
    %12 = vector.broadcast %10 : vector<4x1xf32> to vector<4x256xf32>
    %13 = vector.broadcast %11 : vector<1x256xf32> to vector<4x256xf32>
    %14 = arith.mulf %12, %13 : vector<4x256xf32>
    %15 = arith.addf %9, %14 : vector<4x256xf32>
    %16 = vector.extract_strided_slice %0 {offsets = [0, 2], sizes = [4, 1], strides = [1, 1]} : vector<4x4xf32> to vector<4x1xf32>
    %17 = vector.extract_strided_slice %4 {offsets = [2, 0], sizes = [1, 256], strides = [1, 1]} : vector<4x256xf32> to vector<1x256xf32>
    %18 = vector.broadcast %16 : vector<4x1xf32> to vector<4x256xf32>
    %19 = vector.broadcast %17 : vector<1x256xf32> to vector<4x256xf32>
    %20 = arith.mulf %18, %19 : vector<4x256xf32>
    %21 = arith.addf %15, %20 : vector<4x256xf32>
    %22 = vector.extract_strided_slice %0 {offsets = [0, 3], sizes = [4, 1], strides = [1, 1]} : vector<4x4xf32> to vector<4x1xf32>
    %23 = vector.extract_strided_slice %4 {offsets = [3, 0], sizes = [1, 256], strides = [1, 1]} : vector<4x256xf32> to vector<1x256xf32>
    %24 = vector.broadcast %22 : vector<4x1xf32> to vector<4x256xf32>
    %25 = vector.broadcast %23 : vector<1x256xf32> to vector<4x256xf32>
    %26 = arith.mulf %24, %25 : vector<4x256xf32>
    %27 = arith.addf %21, %26 : vector<4x256xf32>
    %28 = vector.extract_strided_slice %2 {offsets = [0, 0], sizes = [4, 1], strides = [1, 1]} : vector<8x4xf32> to vector<4x1xf32>
    %29 = vector.broadcast %28 : vector<4x1xf32> to vector<4x256xf32>
    %30 = arith.addf %27, %29 : vector<4x256xf32>
    %31 = vector.extract_strided_slice %2 {offsets = [0, 1], sizes = [4, 1], strides = [1, 1]} : vector<8x4xf32> to vector<4x1xf32>
    %cst = arith.constant 0.000000e+00 : f32
    %32 = vector.broadcast %cst : f32 to vector<4x256xf32>
    %33 = arith.cmpf ogt, %30, %32 : vector<4x256xf32>
    %34 = vector.broadcast %31 : vector<4x1xf32> to vector<4x256xf32>
    %35 = arith.mulf %34, %30 : vector<4x256xf32>
    %36 = arith.select %33, %30, %35 : vector<4x256xi1>, vector<4x256xf32>
    %c17_i32 = arith.constant 17 : i32
    %37 = tpu.dynamic_rotate %36 by %c17_i32 dim 1 : vector<4x256xf32>, i32 -> vector<4x256xf32>
    %c0_8 = arith.constant 0 : index
    %c0_9 = arith.constant 0 : index
    %c0_10 = arith.constant 0 : index
    %38 = vector.load %arg5[%c0_8, %c0_9, %c0_10] : memref<9x4x256xf32, #tpu.memory_space<vmem>>, vector<1x4x256xf32>
    %39 = vector.shape_cast %38 : vector<1x4x256xf32> to vector<4x256xf32>
    %40 = arith.mulf %37, %39 : vector<4x256xf32>
    %c16_i32 = arith.constant 16 : i32
    %41 = tpu.dynamic_rotate %36 by %c16_i32 dim 1 : vector<4x256xf32>, i32 -> vector<4x256xf32>
    %c1 = arith.constant 1 : index
    %c0_11 = arith.constant 0 : index
    %c0_12 = arith.constant 0 : index
    %42 = vector.load %arg5[%c1, %c0_11, %c0_12] : memref<9x4x256xf32, #tpu.memory_space<vmem>>, vector<1x4x256xf32>
    %43 = vector.shape_cast %42 : vector<1x4x256xf32> to vector<4x256xf32>
    %44 = arith.mulf %41, %43 : vector<4x256xf32>
    %45 = arith.addf %40, %44 : vector<4x256xf32>
    %c15_i32 = arith.constant 15 : i32
    %46 = tpu.dynamic_rotate %36 by %c15_i32 dim 1 : vector<4x256xf32>, i32 -> vector<4x256xf32>
    %c2 = arith.constant 2 : index
    %c0_13 = arith.constant 0 : index
    %c0_14 = arith.constant 0 : index
    %47 = vector.load %arg5[%c2, %c0_13, %c0_14] : memref<9x4x256xf32, #tpu.memory_space<vmem>>, vector<1x4x256xf32>
    %48 = vector.shape_cast %47 : vector<1x4x256xf32> to vector<4x256xf32>
    %49 = arith.mulf %46, %48 : vector<4x256xf32>
    %50 = arith.addf %45, %49 : vector<4x256xf32>
    %c1_i32 = arith.constant 1 : i32
    %51 = tpu.dynamic_rotate %36 by %c1_i32 dim 1 : vector<4x256xf32>, i32 -> vector<4x256xf32>
    %c3 = arith.constant 3 : index
    %c0_15 = arith.constant 0 : index
    %c0_16 = arith.constant 0 : index
    %52 = vector.load %arg5[%c3, %c0_15, %c0_16] : memref<9x4x256xf32, #tpu.memory_space<vmem>>, vector<1x4x256xf32>
    %53 = vector.shape_cast %52 : vector<1x4x256xf32> to vector<4x256xf32>
    %54 = arith.mulf %51, %53 : vector<4x256xf32>
    %55 = arith.addf %50, %54 : vector<4x256xf32>
    %c4 = arith.constant 4 : index
    %c0_17 = arith.constant 0 : index
    %c0_18 = arith.constant 0 : index
    %56 = vector.load %arg5[%c4, %c0_17, %c0_18] : memref<9x4x256xf32, #tpu.memory_space<vmem>>, vector<1x4x256xf32>
    %57 = vector.shape_cast %56 : vector<1x4x256xf32> to vector<4x256xf32>
    %58 = arith.mulf %36, %57 : vector<4x256xf32>
    %59 = arith.addf %55, %58 : vector<4x256xf32>
    %c255_i32 = arith.constant 255 : i32
    %60 = tpu.dynamic_rotate %36 by %c255_i32 dim 1 : vector<4x256xf32>, i32 -> vector<4x256xf32>
    %c5 = arith.constant 5 : index
    %c0_19 = arith.constant 0 : index
    %c0_20 = arith.constant 0 : index
    %61 = vector.load %arg5[%c5, %c0_19, %c0_20] : memref<9x4x256xf32, #tpu.memory_space<vmem>>, vector<1x4x256xf32>
    %62 = vector.shape_cast %61 : vector<1x4x256xf32> to vector<4x256xf32>
    %63 = arith.mulf %60, %62 : vector<4x256xf32>
    %64 = arith.addf %59, %63 : vector<4x256xf32>
    %c241_i32 = arith.constant 241 : i32
    %65 = tpu.dynamic_rotate %36 by %c241_i32 dim 1 : vector<4x256xf32>, i32 -> vector<4x256xf32>
    %c6 = arith.constant 6 : index
    %c0_21 = arith.constant 0 : index
    %c0_22 = arith.constant 0 : index
    %66 = vector.load %arg5[%c6, %c0_21, %c0_22] : memref<9x4x256xf32, #tpu.memory_space<vmem>>, vector<1x4x256xf32>
    %67 = vector.shape_cast %66 : vector<1x4x256xf32> to vector<4x256xf32>
    %68 = arith.mulf %65, %67 : vector<4x256xf32>
    %69 = arith.addf %64, %68 : vector<4x256xf32>
    %c240_i32 = arith.constant 240 : i32
    %70 = tpu.dynamic_rotate %36 by %c240_i32 dim 1 : vector<4x256xf32>, i32 -> vector<4x256xf32>
    %c7 = arith.constant 7 : index
    %c0_23 = arith.constant 0 : index
    %c0_24 = arith.constant 0 : index
    %71 = vector.load %arg5[%c7, %c0_23, %c0_24] : memref<9x4x256xf32, #tpu.memory_space<vmem>>, vector<1x4x256xf32>
    %72 = vector.shape_cast %71 : vector<1x4x256xf32> to vector<4x256xf32>
    %73 = arith.mulf %70, %72 : vector<4x256xf32>
    %74 = arith.addf %69, %73 : vector<4x256xf32>
    %c239_i32 = arith.constant 239 : i32
    %75 = tpu.dynamic_rotate %36 by %c239_i32 dim 1 : vector<4x256xf32>, i32 -> vector<4x256xf32>
    %c8 = arith.constant 8 : index
    %c0_25 = arith.constant 0 : index
    %c0_26 = arith.constant 0 : index
    %76 = vector.load %arg5[%c8, %c0_25, %c0_26] : memref<9x4x256xf32, #tpu.memory_space<vmem>>, vector<1x4x256xf32>
    %77 = vector.shape_cast %76 : vector<1x4x256xf32> to vector<4x256xf32>
    %78 = arith.mulf %75, %77 : vector<4x256xf32>
    %79 = arith.addf %74, %78 : vector<4x256xf32>
    %80 = vector.extract_strided_slice %1 {offsets = [0, 0], sizes = [8, 1], strides = [1, 1]} : vector<8x4xf32> to vector<8x1xf32>
    %81 = vector.extract_strided_slice %79 {offsets = [0, 0], sizes = [1, 256], strides = [1, 1]} : vector<4x256xf32> to vector<1x256xf32>
    %82 = vector.broadcast %80 : vector<8x1xf32> to vector<8x256xf32>
    %83 = vector.broadcast %81 : vector<1x256xf32> to vector<8x256xf32>
    %84 = arith.mulf %82, %83 : vector<8x256xf32>
    %85 = vector.extract_strided_slice %1 {offsets = [0, 1], sizes = [8, 1], strides = [1, 1]} : vector<8x4xf32> to vector<8x1xf32>
    %86 = vector.extract_strided_slice %79 {offsets = [1, 0], sizes = [1, 256], strides = [1, 1]} : vector<4x256xf32> to vector<1x256xf32>
    %87 = vector.broadcast %85 : vector<8x1xf32> to vector<8x256xf32>
    %88 = vector.broadcast %86 : vector<1x256xf32> to vector<8x256xf32>
    %89 = arith.mulf %87, %88 : vector<8x256xf32>
    %90 = arith.addf %84, %89 : vector<8x256xf32>
    %91 = vector.extract_strided_slice %1 {offsets = [0, 2], sizes = [8, 1], strides = [1, 1]} : vector<8x4xf32> to vector<8x1xf32>
    %92 = vector.extract_strided_slice %79 {offsets = [2, 0], sizes = [1, 256], strides = [1, 1]} : vector<4x256xf32> to vector<1x256xf32>
    %93 = vector.broadcast %91 : vector<8x1xf32> to vector<8x256xf32>
    %94 = vector.broadcast %92 : vector<1x256xf32> to vector<8x256xf32>
    %95 = arith.mulf %93, %94 : vector<8x256xf32>
    %96 = arith.addf %90, %95 : vector<8x256xf32>
    %97 = vector.extract_strided_slice %1 {offsets = [0, 3], sizes = [8, 1], strides = [1, 1]} : vector<8x4xf32> to vector<8x1xf32>
    %98 = vector.extract_strided_slice %79 {offsets = [3, 0], sizes = [1, 256], strides = [1, 1]} : vector<4x256xf32> to vector<1x256xf32>
    %99 = vector.broadcast %97 : vector<8x1xf32> to vector<8x256xf32>
    %100 = vector.broadcast %98 : vector<1x256xf32> to vector<8x256xf32>
    %101 = arith.mulf %99, %100 : vector<8x256xf32>
    %102 = arith.addf %96, %101 : vector<8x256xf32>
    %103 = vector.extract_strided_slice %2 {offsets = [0, 2], sizes = [8, 1], strides = [1, 1]} : vector<8x4xf32> to vector<8x1xf32>
    %104 = vector.broadcast %103 : vector<8x1xf32> to vector<8x256xf32>
    %105 = arith.addf %102, %104 : vector<8x256xf32>
    %c0_27 = arith.constant 0 : index
    %c0_28 = arith.constant 0 : index
    %c0_29 = arith.constant 0 : index
    %c0_30 = arith.constant 0 : index
    %106 = vector.load %arg2[%c0_27, %c0_28, %c0_29, %c0_30] : memref<1x1x8x256xf32, #tpu.memory_space<vmem>>, vector<1x1x8x256xf32>
    %107 = vector.shape_cast %106 : vector<1x1x8x256xf32> to vector<8x256xf32>
    %108 = arith.addf %105, %107 : vector<8x256xf32>
    %109 = vector.extract_strided_slice %2 {offsets = [0, 3], sizes = [8, 1], strides = [1, 1]} : vector<8x4xf32> to vector<8x1xf32>
    %cst_31 = arith.constant 0.000000e+00 : f32
    %110 = vector.broadcast %cst_31 : f32 to vector<8x256xf32>
    %111 = arith.cmpf ogt, %108, %110 : vector<8x256xf32>
    %112 = vector.broadcast %109 : vector<8x1xf32> to vector<8x256xf32>
    %113 = arith.mulf %112, %108 : vector<8x256xf32>
    %114 = arith.select %111, %108, %113 : vector<8x256xi1>, vector<8x256xf32>
    %c0_32 = arith.constant 0 : index
    %c0_33 = arith.constant 0 : index
    %c0_34 = arith.constant 0 : index
    %115 = vector.load %arg7[%c0_32, %c0_33, %c0_34] : memref<1x8x256xf32, #tpu.memory_space<vmem>>, vector<1x8x256xf32>
    %116 = vector.shape_cast %115 : vector<1x8x256xf32> to vector<8x256xf32>
    %117 = vector.shape_cast %114 : vector<8x256xf32> to vector<1x8x256xf32>
    tpu.vector_store %arg7[%c0_32, %c0_33, %c0_34], %117 {strides = array<i32>} : memref<1x8x256xf32, #tpu.memory_space<vmem>>, vector<1x8x256xf32>,
    return
  }
  func.func @transform_0(%arg0: i32) -> (i32, i32, i32) {
    %c0_i32 = arith.constant 0 : i32
    %c0_i32_0 = arith.constant 0 : i32
    %c0_i32_1 = arith.constant 0 : i32
    return %arg0, %c0_i32, %c0_i32_0 : i32, i32, i32
  }
  func.func @transform_1(%arg0: i32) -> (i32, i32, i32, i32) {
    %c0_i32 = arith.constant 0 : i32
    %c0_i32_0 = arith.constant 0 : i32
    %c0_i32_1 = arith.constant 0 : i32
    %c0_i32_2 = arith.constant 0 : i32
    return %arg0, %c0_i32, %c0_i32_0, %c0_i32_1 : i32, i32, i32, i32
  }
  func.func @transform_2(%arg0: i32) -> (i32, i32) {
    %c0_i32 = arith.constant 0 : i32
    %c0_i32_0 = arith.constant 0 : i32
    %c0_i32_1 = arith.constant 0 : i32
    return %c0_i32, %c0_i32_0 : i32, i32
  }
  func.func @transform_3(%arg0: i32) -> (i32, i32) {
    %c0_i32 = arith.constant 0 : i32
    %c0_i32_0 = arith.constant 0 : i32
    %c0_i32_1 = arith.constant 0 : i32
    return %c0_i32, %c0_i32_0 : i32, i32
  }
  func.func @transform_4(%arg0: i32) -> (i32, i32, i32) {
    %c0_i32 = arith.constant 0 : i32
    %c0_i32_0 = arith.constant 0 : i32
    %c0_i32_1 = arith.constant 0 : i32
    %c0_i32_2 = arith.constant 0 : i32
    return %c0_i32, %c0_i32_0, %c0_i32_1 : i32, i32, i32
  }
  func.func @transform_5(%arg0: i32) -> (i32, i32) {
    %c0_i32 = arith.constant 0 : i32
    %c0_i32_0 = arith.constant 0 : i32
    %c0_i32_1 = arith.constant 0 : i32
    return %c0_i32, %c0_i32_0 : i32, i32
  }
  func.func @transform_6(%arg0: i32) -> (i32, i32, i32) {
    %c0_i32 = arith.constant 0 : i32
    %c0_i32_0 = arith.constant 0 : i32
    %c0_i32_1 = arith.constant 0 : i32
    return %arg0, %c0_i32, %c0_i32_0 : i32, i32, i32
  }
}

</mosaic_0001>

<bundles_post_ra>
// kernel: tpu_custom_call.1
= control target key start
LH: loop header
LB: loop body
LE: loop exit
PB: predicated region body
PF: predicated region fallthrough
CT: control target
= control target key end

     0   :  { %s1310_s0 = inlined_call_operand.vmem [shape: f32[2,4,256], index: 0, kind: input, shape index: {}]   ;;  %s1311_s1 = inlined_call_operand.hbm [shape: f32[2,1,8,256], index: 1, kind: input, shape index: {}]   ;;  %s1312_s2 = inlined_call_operand.vmem [shape: f32[4,4], index: 2, kind: input, shape index: {}]   ;;  %s1313_s3 = inlined_call_operand.vmem [shape: f32[8,4], index: 3, kind: input, shape index: {}]   ;;  %s1314_s4 = inlined_call_operand.hbm [shape: f32[9,4,256], index: 4, kind: input, shape index: {}]   ;;  %s1315_s5 = inlined_call_operand.vmem [shape: f32[8,4], index: 5, kind: input, shape index: {}]   ;;  %s1316_s6 = inlined_call_operand.hbm [shape: f32[2,8,256], index: 6, kind: output, shape index: {}]  }
   0x1   :  { %1321 = sst [smem:[#allocation11_spill]] %s1314_s4 }
   0x2   :  { %11 = vsyncpa [#allocation3], 0 }
   0x3   :  { %13 = vsyncpa [#allocation3 + $0x1], 0 }
   0x4   :  { %14 = vsyncpa [#allocation6], 0 }
   0x5   :  { %15 = vsyncpa [#allocation4], 0 }
   0x6   :  { %17 = vsyncpa [#allocation4 + $0x1], 0  ;;  %s1041_s21 = smov 0   ;;  %s1043_s22 = smov 0  }
   0x7   :  { %s1045_s23 = smov 0   ;;  %s1047_s24 = smov 0  }
   0x8 LB: > { %s1062_s25 = sadd.s32 4294967295, %s987_s24   ;;  %s756_s26 = sadd.s32 4294967294, %s987_s24   ;;  %s987_s24 = sphi %s1047_s24, %s1340_s24   ;;  %s983_s23 = sphi %s1045_s23, %s1339_s23   ;;  %s979_s22 = sphi %s1043_s22, %s1338_s22   ;;  %s975_s21 = sphi %s1041_s21, %s1337_s21  }
   0x9   : > { %p69_p0 = scmp.ne.s32.totalorder %s979_s22, %s975_s21  ;;  %p1317_p1 = scmp.eq.s32.totalorder %s1062_s25, 0 }
   0xa   : > { %p183_p3 = scmp.eq.s32.totalorder %s756_s26, 1  ;;  %p757_p5 = scmp.ge.s32.totalorder %s987_s24, 1 }
   0xb   : > { %p1071_p4 = por %p1317_p1, %p69_p0  ;;  %p190_p7 = scmp.lt.s32.totalorder %s987_s24, 3 }
   0xc   : > { %p1076_p6 = por %p183_p3, %p69_p0  ;;  %s989_s30 = smov [#allocation5]  }
   0xd   : > { %s1322_s27 = scalar_select %p1071_p4, 1, 0 }
   0xe   : > { %s1323_s28 = scalar_select %p1076_p6, 1, 0 }
   0xf   : > { %p1081_p8 = pnand %p757_p5, %p190_p7  ;;  %s208_s7 = sshll.u32 %s989_s30, 4  ;;  %s209_s7 = int_to_ptr.vmem [resolvable:$true] %s208_s7 }
  0x10   : > { %s1095_s9 = sadd.s32 1, %s987_s24   ;;  %s56_s10 = sadd.s32 1, %s983_s23 }
  0x11   : > { %s1324_s29 = scalar_select %p1081_p8, 1, 0 }
  0x12   : > { %p785_p9 = pneg %p1081_p8  ;;  %s53_s11 = ssub.s32 %s987_s24, %s1095_s9 }
  0x13   : > { %s876_s12 = scalar_lea.vmem %s209_s7, 1152  ;;  %p884_p5 = scmp.lt.s32.totalorder %s209_s7, %s209_s7 }
  0x14   : > { %p1090_p11 = pnand %p785_p9, %p1317_p1  ;;  %p877_p13 = scmp.ne.s32.totalorder %s209_s7, %s876_s12 }
  0x15   : > { %p885_p7 = scmp.lt.s32.totalorder %s876_s12, %s876_s12 }
  0x16   : > { %p867_p12 = pneg %p1090_p11 }
  0x17   : > { %p886_p10 = por %p885_p7, %p884_p5 }
  0x18   : > { %p879_p0 = pnand %p877_p13, %p867_p12 }
  0x1a   : > { %p880_p3 = pneg %p879_p0 }
  0x1c   : > { %p887_p2 = pnand %p886_p10, %p880_p3 }
  0x1e   : > { %890 = shalt.err (!%p887_p2)
}
  0x1f   : > { %s990_s13 = smov 128   ;;  %s991_s14 = smov 8  }
  0x20   : > { %s1326_s4 = sld [smem:[#allocation11_spill]]  ;;  %p54_p9 = scmp.eq.s32.totalorder %s53_s11, 0 }
  0x21   : > { %p63_p12 = scmp.ne.s32.totalorder %s983_s23, %s979_s22  ;;  %p64_p10 = scmp.eq.s32.totalorder %s987_s24, 0 }
  0x22   : > { %p798_p2 = scmp.lt.s32.totalorder %s987_s24, 2  ;;  %p1327_p0 = scmp.eq.s32.totalorder %s1062_s25, 1 }
  0x23   : > { %s1112_s17 = scalar_select %p54_p9, %s983_s23, %s56_s10  }
  0x24   : > { %p65_p13 = por %p64_p10, %p63_p12  ;;  %p1116_p3 = por %p1327_p0, %p63_p12 }
  0x25   : > { %s233_s19 = sand.u32 1, %s983_s23   ;;  %s774_s20 = sshll.u32 %s987_s24, 8 }
  0x26   : > { %788 = dma.hbm_to_vmem [thread:$0]  (!%p1090_p11), %s1326_s4, 1152, %s209_s7, [#allocation6], %s990_s13, %s990_s13, %s991_s14  }
  0x27   : > { %s1328_s18 = scalar_select %p1116_p3, 1, 0 }
  0x28   : > { %s760_s26 = sshll.u32 %s233_s19, 4  ;;  %s1125_s12 = scalar_lea.hbm %s1311_s1, %s774_s20 }
  0x29   : > { %s237_s7 = scalar_lea.vmem [#allocation2], %s760_s26  ;;  %p1127_p11 = pnand %p798_p2, %p65_p13 }
  0x2a   : > { %s245_s10 = sshll.u32 %s237_s7, 4  ;;  %s234_s13 = scalar_lea.sflag [#allocation3], %s233_s19  ;;  %s246_s10 = int_to_ptr.vmem [resolvable:$true] %s245_s10 }
  0x2b   : > { %s891_s14 = scalar_lea.hbm %s1125_s12, 256  ;;  %p893_p7 = pneg %p1127_p11 }
  0x2c   : > { %p892_p5 = scmp.ne.s32.totalorder %s1125_s12, %s891_s14  ;;  %s896_s20 = scalar_lea.hbm %s1311_s1, 512 }
  0x2d   : > { %p897_p10 = scmp.lt.s32.totalorder %s1125_s12, %s1311_s1  ;;  %p898_p2 = scmp.lt.s32.totalorder %s896_s20, %s891_s14 }
  0x2e   : > { %p894_p9 = pnand %p893_p7, %p892_p5 }
  0x2f   : > { %p899_p13 = por %p898_p2, %p897_p10 }
  0x30   : > { %p895_p12 = pneg %p894_p9 }
  0x32   : > { %p900_p0 = pnand %p899_p13, %p895_p12 }
  0x34   : > { %903 = shalt.err (!%p900_p0)
}
  0x35   : > { %s904_s8 = scalar_lea.vmem %s246_s10, 256  ;;  %s992_s19 = smov [#allocation2]  }
  0x36   : > { %p905_p1 = scmp.ne.s32.totalorder %s246_s10, %s904_s8  ;;  %s909_s7 = sshll.u32 %s992_s19, 4  ;;  %s910_s7 = int_to_ptr.vmem [resolvable:$false] %s909_s7 }
  0x37   : > { %s911_s4 = scalar_lea.vmem %s910_s7, 512  ;;  %p912_p5 = scmp.lt.s32.totalorder %s246_s10, %s910_s7 }
  0x38   : > { %p907_p6 = pnand %p905_p1, %p893_p7  ;;  %p913_p9 = scmp.lt.s32.totalorder %s911_s4, %s904_s8 }
  0x3a   : > { %p908_p3 = pneg %p907_p6  ;;  %p914_p4 = por %p913_p9, %p912_p5 }
  0x3c   : > { %p915_p8 = pnand %p914_p4, %p908_p3 }
  0x3e   : > { %918 = shalt.err (!%p915_p8)
}
  0x3f   : > { %792 = dma.hbm_to_vmem [thread:$0]  (!%p1127_p11), %s1125_s12, 256, %s246_s10, %s234_s13  }
  0x40   : > { %p1330_p12 = scmp.ne.s32.totalorder %s1324_s29, 0 }
  0x41   : > { %s1148_s14 = sand.u32 (!%p1330_p12), 1, %s979_s22   ;;  %p1331_p1 = scmp.ne.s32.totalorder (!%p1330_p12), %s1322_s27, 0 }
  0x42   : > { %254 = sbr.rel (%p1330_p12) target bundleno = 404 (0x194), region = 44  ;;  %s764_s15 = sshll.u32 (!%p1330_p12), %s1148_s14, 4 }
  0x43   : > { %s257_s16 = scalar_lea.sflag (!%p1330_p12), [#allocation3], %s1148_s14  ;;  %s1154_s4 = scalar_lea.vmem (!%p1330_p12), [#allocation2], %s764_s15 }
  0x47   : > { %962 = dma.done.wait (%p1331_p1), %s257_s16, 256  }
  0x48   : > { %964 = vsyncadd (%p1331_p1), %s257_s16, 4294967040  ;;  %p1332_p4 = scmp.eq.s32.totalorder %s1062_s25, 0 }
  0x4a   : > { %966 = dma.done.wait (%p1332_p4), [#allocation6], 1152   ;;  %p1333_p6 = pmov %p1332_p4 }
  0x4b   : > { %v993_v0 = vmov 2   ;;  %v994_v1 = vmov 0   ;;  %v303_v2 = vld [vmem:[%s1312_s2] sm:$0xf]  ;;  %v995_v3 = vmov 3   ;;  %v996_v4 = vmov 1  }
  0x4c   : > { %968 = vsyncadd (%p1333_p6), [#allocation6], 4294966144  ;;  %850 = vset.pattern.permute.xlu1 %v993_v0  ;;  %848 = vset.pattern.permute.xlu0 %v994_v1  ;;  %v1171_v5 = vld [vmem:[%s1315_s5] sm:$0xff]  ;;  %p298_p8 = scmp.lt.s32.totalorder %s1062_s25, 1  ;;  %v313_v7 = vlaneseq  ;;  %s997_s7 = smov 17  }
  0x4d   : > { %360 = vperm.xlu1 %850, %v303_v2   ;;  %309 = vperm.xlu0 %848, %v303_v2   ;;  %v1178_v6 = vld [vmem:[%s1313_s3] sm:$0xff]  ;;  %s998_s16 = smov 16   ;;  %s999_s29 = smov 15  }
  0x4e   : > { %s299_s20 = scalar_select %p298_p8, %s1062_s25, 1  ;;  %v314_v8 = vshrl.u32 %v313_v7, 7  ;;  %v1237_v63 = vand.u32 127, %v313_v7 }
  0x4f   : > { %s1000_s12 = smov 1   ;;  %s1001_s27 = smov 127  }
  0x50   : > { %s775_s30 = sshll.u32 %s299_s20, 3  ;;  %v1187_v9 = vsub.s32 0, %v314_v8  ;;  %v319_v10 = vsub.s32 4, %v314_v8  ;;  %v1189_v11 = vsub.s32 1, %v314_v8  ;;  %v343_v12 = vsub.s32 5, %v314_v8  ;;  %s1002_s10 = smov 113  }
  0x51   : > { %851 = vset.pattern.permute.xlu1 %v995_v3  ;;  %849 = vset.pattern.permute.xlu0 %v996_v4  ;;  %s302_s19 = scalar_lea.vmem %s1310_s0, %s775_s30  ;;  %v1191_v14 = vsub.s32 2, %v314_v8  ;;  %v369_v15 = vsub.s32 6, %v314_v8  ;;  %v1193_v16 = vsub.s32 3, %v314_v8  ;;  %v395_v17 = vsub.s32 7, %v314_v8  ;;  %s1003_s11 = smov 112   ;;  %v437_v4 = vld [vmem:[#allocation5] sm:$0xff] }
  0x52   : > { %386 = vperm.xlu1 %851, %v303_v2   ;;  %334 = vperm.xlu0 %849, %v303_v2   ;;  %v306_v13 = vld [vmem:[%s302_s19] sm:$0xff]  ;;  %s1004_s13 = smov 111   ;;  %v451_v2 = vld [vmem:[#allocation5 + $0x8] sm:$0xff]  ;;  %vm447_vm2 = vcmp.lt.s32.totalorder %v1237_v63, 16  ;;  %v467_v8 = vld [vmem:[#allocation5 + $0x10] sm:$0xff]  ;;  %vm434_vm3 = vcmp.lt.s32.totalorder %v1237_v63, 17 }
  0x53   : > { %v316_v18 = vrot.slane %v306_v13, %v1187_v9  ;;  %v320_v19 = vrot.slane %v306_v13, %v319_v10  ;;  %v340_v20 = vrot.slane %v306_v13, %v1189_v11  ;;  %v344_v21 = vrot.slane %v306_v13, %v343_v12  ;;  %s776_s20 = sshll.u32 %s1062_s25, 8  ;;  %s297_s30 = scalar_lea.vmem [#allocation7], %s764_s15 }
  0x54   : > { %v366_v22 = vrot.slane %v306_v13, %v1191_v14  ;;  %v370_v23 = vrot.slane %v306_v13, %v369_v15  ;;  %v392_v25 = vrot.slane %v306_v13, %v1193_v16  ;;  %v396_v26 = vrot.slane %v306_v13, %v395_v17  ;;  %v483_v13 = vld [vmem:[#allocation5 + $0x18] sm:$0xff]  ;;  %s664_s26 = sshll.u32 %s297_s30, 4  ;;  %s650_s25 = scalar_lea.sflag [#allocation4], %s1148_s14  ;;  %s1269_s26 = int_to_ptr.vmem [resolvable:$true] %s664_s26 }
  0x55   : > { %v326_v28 = vrot.slane %v316_v18, %v1187_v9  ;;  %v330_v29 = vrot.slane %v320_v19, %v1187_v9  ;;  %v350_v30 = vrot.slane %v340_v20, %v1189_v11  ;;  %v354_v31 = vrot.slane %v344_v21, %v1189_v11  ;;  %s919_s15 = scalar_lea.vmem %s1269_s26, 256  ;;  %p1334_p11 = scmp.ne.s32.totalorder %s1328_s18, 0 }
  0x56   : > { %852 = vset.pattern.permute.xlu1 %v994_v1  ;;  %421 = vperm.xlu0 %849, %v1171_v5   ;;  %v376_v32 = vrot.slane %v366_v22, %v1191_v14  ;;  %v380_v33 = vrot.slane %v370_v23, %v1191_v14  ;;  %v402_v34 = vrot.slane %v392_v25, %v1193_v16  ;;  %vm463_vm4 = vcmp.lt.s32.totalorder %v1237_v63, 15  ;;  %p920_p3 = scmp.ne.s32.totalorder %s1269_s26, %s919_s15 }
  0x57   : > { %413 = vperm.xlu1 %852, %v1171_v5   ;;  %v406_v35 = vrot.slane %v396_v26, %v1193_v16  ;;  %v439_v15 = vcombine.high %v437_v4, %v437_v4  ;;  %v469_v7 = vcombine.high %v467_v8, %v467_v8  ;;  %vm479_vm5 = vcmp.lt.s32.totalorder %v1237_v63, 1 }
  0x58   : > { %vm504_vm6 = vcmp.lt.s32.totalorder %v1237_v63, 127  ;;  %vm520_vm7 = vcmp.lt.s32.totalorder %v1237_v63, 113  ;;  %vm536_vm8 = vcmp.lt.s32.totalorder %v1237_v63, 112  ;;  %vm552_vm9 = vcmp.lt.s32.totalorder %v1237_v63, 111  ;;  %p921_p7 = pnand %p920_p3, %p1334_p11 }
  0x5a   : > { %p922_p10 = pneg %p921_p7 }
  0x5b   : > { %566 = vperm.xlu1 %852, %v1178_v6  }
  0x5f   : > { %853 = vset.pattern.permute.xlu1 %v993_v0 }
  0xc8   : > { %v310_v24 = vpop.permute.xlu0 %309  ;;  %v361_v27 = vpop.permute.xlu1 %360 }
  0xc9   : > { %v331_v37 = vmul.f32 %v326_v28, %v310_v24  ;;  %v332_v38 = vmul.f32 %v330_v29, %v310_v24  ;;  %v381_v41 = vmul.f32 %v376_v32, %v361_v27  ;;  %v382_v42 = vmul.f32 %v380_v33, %v361_v27  ;;  %v492_v32 = vld [vmem:[#allocation5 + $0x20] sm:$0xff] }
  0xca   : > { %v485_v24 = vcombine.high %v483_v13, %v483_v13 }
  0xcd   : > { %v335_v36 = vpop.permute.xlu0 %334  ;;  %v387_v43 = vpop.permute.xlu1 %386 }
  0xce   : > { %v355_v39 = vmul.f32 %v350_v30, %v335_v36  ;;  %v356_v40 = vmul.f32 %v354_v31, %v335_v36  ;;  %v407_v46 = vmul.f32 %v402_v34, %v387_v43  ;;  %v408_v47 = vmul.f32 %v406_v35, %v387_v43  ;;  %v524_v43 = vld [vmem:[#allocation5 + $0x30] sm:$0xff] }
  0xd0   : > { %v357_v44 = vadd.f32 %v355_v39, %v331_v37  ;;  %v358_v45 = vadd.f32 %v356_v40, %v332_v38  ;;  %v508_v39 = vld [vmem:[#allocation5 + $0x28] sm:$0xff] }
  0xd1   : > { %v422_v55 = vpop.permute.xlu0 %421 }
  0xd2   : > { %v383_v48 = vadd.f32 %v381_v41, %v357_v44  ;;  %v384_v49 = vadd.f32 %v382_v42, %v358_v45  ;;  %v414_v52 = vpop.permute.xlu1 %413  ;;  %v494_v42 = vcombine.high %v492_v32, %v492_v32 }
  0xd4   : > { %v409_v50 = vadd.f32 %v407_v46, %v383_v48  ;;  %v410_v51 = vadd.f32 %v408_v47, %v384_v49  ;;  %v510_v46 = vcombine.high %v508_v39, %v508_v39  ;;  %v540_v49 = vld [vmem:[#allocation5 + $0x38] sm:$0xff] }
  0xd6   : > { %v416_v53 = vadd.f32 %v414_v52, %v409_v50  ;;  %v417_v54 = vadd.f32 %v414_v52, %v410_v51  ;;  %v1234_v60 = vpop.permute.xlu1 %566 }
  0xd8   : > { %vm418_vm0 = vcmp.gt.f32.partialorder %v416_v53, 0.0  ;;  %vm419_vm1 = vcmp.gt.f32.partialorder %v417_v54, 0.0  ;;  %v424_v56 = vmul.f32 %v422_v55, %v416_v53  ;;  %v425_v57 = vmul.f32 %v422_v55, %v417_v54 }
  0xda   : > { %v1207_v58 = vsel %vm418_vm0, %v416_v53, %v424_v56  ;;  %v1209_v59 = vsel %vm419_vm1, %v417_v54, %v425_v57  ;;  %v526_v54 = vcombine.high %v524_v43, %v524_v43  ;;  %v542_v57 = vcombine.high %v540_v49, %v540_v49 }
  0xdb   : > { %430 = vrot.lane.b32.xlu0 %v1209_v59, %s997_s7  ;;  %428 = vrot.lane.b32.xlu1 %v1207_v58, %s997_s7  ;;  %v497_v52 = vmul.f32 %v494_v42, %v1209_v59  ;;  %v496_v53 = vmul.f32 %v492_v32, %v1207_v58  ;;  %s1267_s7 = scalar_lea.hbm %s1316_s6, %s776_s20 }
  0xdf   : > { %445 = vrot.lane.b32.xlu0 %v1209_v59, %s998_s16  ;;  %443 = vrot.lane.b32.xlu1 %v1207_v58, %s998_s16 }
  0xe3   : > { %461 = vrot.lane.b32.xlu0 %v1209_v59, %s999_s29  ;;  %459 = vrot.lane.b32.xlu1 %v1207_v58, %s999_s29 }
  0xe7   : > { %477 = vrot.lane.b32.xlu0 %v1209_v59, %s1000_s12  ;;  %475 = vrot.lane.b32.xlu1 %v1207_v58, %s1000_s12 }
  0xeb   : > { %502 = vrot.lane.b32.xlu0 %v1209_v59, %s1001_s27  ;;  %500 = vrot.lane.b32.xlu1 %v1207_v58, %s1001_s27 }
  0xef   : > { %518 = vrot.lane.b32.xlu0 %v1209_v59, %s1002_s10  ;;  %516 = vrot.lane.b32.xlu1 %v1207_v58, %s1002_s10 }
  0xf3   : > { %534 = vrot.lane.b32.xlu0 %v1209_v59, %s1003_s11  ;;  %532 = vrot.lane.b32.xlu1 %v1207_v58, %s1003_s11 }
  0xf7   : > { %550 = vrot.lane.b32.xlu0 %v1209_v59, %s1004_s13  ;;  %548 = vrot.lane.b32.xlu1 %v1207_v58, %s1004_s13 }
  0xfb   : > { %580 = vperm.xlu0 %849, %v1178_v6   ;;  %596 = vperm.xlu1 %853, %v1178_v6  }
  0xff   : > { %854 = vset.pattern.permute.xlu0 %v995_v3  ;;  %628 = vperm.xlu1 %853, %v1171_v5  }
 0x100   : > { %612 = vperm.xlu0 %854, %v1178_v6   ;;  %v453_v6 = vcombine.high %v451_v2, %v451_v2 }
 0x103   : > { %855 = vset.pattern.permute.xlu1 %v995_v3 }
 0x104   : > { %640 = vperm.xlu1 %855, %v1171_v5  }
 0x14d   : > { %v431_v61 = vpop.permute.xlu0 %430  ;;  %v429_v62 = vpop.permute.xlu1 %428 }
 0x14e   : > { %v435_v17 = vsel %vm434_vm3, %v429_v62, %v431_v61  ;;  %v436_v18 = vsel %vm434_vm3, %v431_v61, %v429_v62  ;;  %v556_v61 = vld [vmem:[#allocation5 + $0x40] sm:$0xff] }
 0x14f   : > { %v441_v28 = vmul.f32 %v437_v4, %v436_v18  ;;  %v442_v29 = vmul.f32 %v439_v15, %v435_v17  ;;  %v558_v58 = vcombine.high %v556_v61, %v556_v61 }
 0x151   : > { %v446_v0 = vpop.permute.xlu0 %445  ;;  %v444_v1 = vpop.permute.xlu1 %443 }
 0x152   : > { %v448_v10 = vsel %vm447_vm2, %v444_v1, %v446_v0  ;;  %v449_v12 = vsel %vm447_vm2, %v446_v0, %v444_v1 }
 0x153   : > { %v455_v21 = vmul.f32 %v451_v2, %v449_v12  ;;  %v456_v22 = vmul.f32 %v453_v6, %v448_v10 }
 0x155   : > { %v462_v3 = vpop.permute.xlu0 %461  ;;  %v460_v5 = vpop.permute.xlu1 %459  ;;  %v457_v33 = vadd.f32 %v455_v21, %v441_v28  ;;  %v458_v34 = vadd.f32 %v456_v22, %v442_v29 }
 0x156   : > { %v464_v19 = vsel %vm463_vm4, %v460_v5, %v462_v3  ;;  %v465_v20 = vsel %vm463_vm4, %v462_v3, %v460_v5 }
 0x157   : > { %v471_v30 = vmul.f32 %v467_v8, %v465_v20  ;;  %v472_v31 = vmul.f32 %v469_v7, %v464_v19 }
 0x159   : > { %v478_v23 = vpop.permute.xlu0 %477  ;;  %v476_v25 = vpop.permute.xlu1 %475  ;;  %v473_v40 = vadd.f32 %v471_v30, %v457_v33  ;;  %v474_v41 = vadd.f32 %v472_v31, %v458_v34 }
 0x15a   : > { %v480_v26 = vsel %vm479_vm5, %v476_v25, %v478_v23  ;;  %v481_v27 = vsel %vm479_vm5, %v478_v23, %v476_v25 }
 0x15b   : > { %v487_v35 = vmul.f32 %v483_v13, %v481_v27  ;;  %v488_v36 = vmul.f32 %v485_v24, %v480_v26 }
 0x15d   : > { %v503_v37 = vpop.permute.xlu0 %502  ;;  %v501_v38 = vpop.permute.xlu1 %500  ;;  %v489_v44 = vadd.f32 %v487_v35, %v473_v40  ;;  %v490_v45 = vadd.f32 %v488_v36, %v474_v41 }
 0x15e   : > { %v505_v50 = vsel %vm504_vm6, %v501_v38, %v503_v37  ;;  %v506_v51 = vsel %vm504_vm6, %v503_v37, %v501_v38 }
 0x15f   : > { %v499_v62 = vadd.f32 %v497_v52, %v490_v45  ;;  %v498_v0 = vadd.f32 %v496_v53, %v489_v44  ;;  %v512_v1 = vmul.f32 %v508_v39, %v505_v50  ;;  %v513_v2 = vmul.f32 %v510_v46, %v506_v51  ;;  %v634_v50 = vld [vmem:[%s1154_s4 + $0x8] sm:$0xff] }
 0x161   : > { %v519_v47 = vpop.permute.xlu0 %518  ;;  %v517_v48 = vpop.permute.xlu1 %516  ;;  %v514_v59 = vadd.f32 %v512_v1, %v498_v0  ;;  %v515_v12 = vadd.f32 %v513_v2, %v499_v62 }
 0x162   : > { %v521_v55 = vsel %vm520_vm7, %v517_v48, %v519_v47  ;;  %v522_v56 = vsel %vm520_vm7, %v519_v47, %v517_v48 }
 0x163   : > { %v528_v5 = vmul.f32 %v524_v43, %v521_v55  ;;  %v529_v10 = vmul.f32 %v526_v54, %v522_v56 }
 0x165   : > { %v535_v4 = vpop.permute.xlu0 %534  ;;  %v533_v8 = vpop.permute.xlu1 %532  ;;  %v530_v20 = vadd.f32 %v528_v5, %v514_v59  ;;  %v531_v21 = vadd.f32 %v529_v10, %v515_v12 }
 0x166   : > { %v537_v6 = vsel %vm536_vm8, %v533_v8, %v535_v4  ;;  %v538_v3 = vsel %vm536_vm8, %v535_v4, %v533_v8 }
 0x167   : > { %v544_v13 = vmul.f32 %v540_v49, %v537_v6  ;;  %v545_v15 = vmul.f32 %v542_v57, %v538_v3  ;;  %v633_v49 = vld [vmem:[%s1154_s4] sm:$0xff]  ;;  %s1005_s4 = smov [#allocation7]  }
 0x168   : > { %s923_s16 = sshll.u32 %s1005_s4, 4  ;;  %s924_s16 = int_to_ptr.vmem [resolvable:$false] %s923_s16 }
 0x169   : > { %v551_v7 = vpop.permute.xlu0 %550  ;;  %v549_v17 = vpop.permute.xlu1 %548  ;;  %v546_v24 = vadd.f32 %v544_v13, %v530_v20  ;;  %v547_v25 = vadd.f32 %v545_v15, %v531_v21  ;;  %s925_s29 = scalar_lea.vmem %s924_s16, 512  ;;  %p926_p2 = scmp.lt.s32.totalorder %s1269_s26, %s924_s16 }
 0x16a   : > { %v553_v18 = vsel %vm552_vm9, %v549_v17, %v551_v7  ;;  %v554_v19 = vsel %vm552_vm9, %v551_v7, %v549_v17  ;;  %p927_p13 = scmp.lt.s32.totalorder %s925_s29, %s919_s15 }
 0x16b   : > { %v560_v22 = vmul.f32 %v556_v61, %v553_v18  ;;  %v561_v23 = vmul.f32 %v558_v58, %v554_v19 }
 0x16c   : > { %p928_p0 = por %p927_p13, %p926_p2 }
 0x16d   : > { %v562_v26 = vadd.f32 %v560_v22, %v546_v24  ;;  %v563_v27 = vadd.f32 %v561_v23, %v547_v25 }
 0x16e   : > { %p929_p5 = pnand %p928_p0, %p922_p10 }
 0x16f   : > { %v572_v28 = vrot.slane %v562_v26, %v1187_v9  ;;  %v576_v63 = vrot.slane %v563_v27, %v1187_v9  ;;  %v586_v29 = vrot.slane %v562_v26, %v1189_v11  ;;  %v590_v30 = vrot.slane %v563_v27, %v1189_v11 }
 0x170   : > { %v606_v32 = vrot.slane %v563_v27, %v1191_v14  ;;  %v602_v34 = vrot.slane %v562_v26, %v1191_v14  ;;  %v618_v11 = vrot.slane %v562_v26, %v1193_v16  ;;  %v622_v42 = vrot.slane %v563_v27, %v1193_v16 }
 0x171   : > { %v577_v35 = vmul.f32 %v572_v28, %v1234_v60  ;;  %v578_v36 = vmul.f32 %v576_v63, %v1234_v60 }
 0x176   : > { %v581_v31 = vpop.permute.xlu0 %580  ;;  %v597_v33 = vpop.permute.xlu1 %596 }
 0x177   : > { %v591_v37 = vmul.f32 %v586_v29, %v581_v31  ;;  %v592_v38 = vmul.f32 %v590_v30, %v581_v31  ;;  %v607_v40 = vmul.f32 %v602_v34, %v597_v33  ;;  %v608_v41 = vmul.f32 %v606_v32, %v597_v33 }
 0x179   : > { %v593_v39 = vadd.f32 %v591_v37, %v577_v35  ;;  %v594_v9 = vadd.f32 %v592_v38, %v578_v36 }
 0x17a   : > { %v629_v60 = vpop.permute.xlu1 %628 }
 0x17b   : > { %v609_v43 = vadd.f32 %v607_v40, %v593_v39  ;;  %v610_v14 = vadd.f32 %v608_v41, %v594_v9  ;;  %v613_v44 = vpop.permute.xlu0 %612 }
 0x17c   : > { %v623_v45 = vmul.f32 %v618_v11, %v613_v44  ;;  %v624_v46 = vmul.f32 %v622_v42, %v613_v44 }
 0x17e   : > { %v625_v47 = vadd.f32 %v623_v45, %v609_v43  ;;  %v626_v48 = vadd.f32 %v624_v46, %v610_v14 }
 0x17f   : > { %v641_v53 = vpop.permute.xlu1 %640 }
 0x180   : > { %v631_v51 = vadd.f32 %v629_v60, %v625_v47  ;;  %v632_v52 = vadd.f32 %v629_v60, %v626_v48 }
 0x182   : > { %v636_v54 = vadd.f32 %v634_v50, %v632_v52  ;;  %v635_v55 = vadd.f32 %v633_v49, %v631_v51 }
 0x184   : > { %vm638_vm10 = vcmp.gt.f32.partialorder %v636_v54, 0.0  ;;  %vm637_vm11 = vcmp.gt.f32.partialorder %v635_v55, 0.0  ;;  %v643_v16 = vmul.f32 %v641_v53, %v635_v55  ;;  %v644_v56 = vmul.f32 %v641_v53, %v636_v54 }
 0x186   : > { %v645_v57 = vsel %vm637_vm11, %v635_v55, %v643_v16  ;;  %v646_v61 = vsel %vm638_vm10, %v636_v54, %v644_v56 }
 0x187   : > { %647 = vst [vmem:[%s297_s30] sm:$0xff] %v645_v57  ;;  %648 = vst [vmem:[%s297_s30 + $0x8] sm:$0xff] %v646_v61 }
 0x188   : > { %932 = shalt.err (!%p929_p5)
}
 0x189   : > { %s933_s12 = scalar_lea.hbm %s1267_s7, 256  ;;  %s937_s10 = scalar_lea.hbm %s1316_s6, 512 }
 0x18a   : > { %p934_p9 = scmp.ne.s32.totalorder %s1267_s7, %s933_s12  ;;  %p938_p4 = scmp.lt.s32.totalorder %s1267_s7, %s1316_s6 }
 0x18b   : > { %p939_p6 = scmp.lt.s32.totalorder %s937_s10, %s933_s12 }
 0x18c   : > { %p935_p12 = pnand %p934_p9, %p1334_p11 }
 0x18d   : > { %p940_p8 = por %p939_p6, %p938_p4 }
 0x18e   : > { %p936_p1 = pneg %p935_p12 }
 0x190   : > { %p941_p3 = pnand %p940_p8, %p936_p1 }
 0x192   : > { %944 = shalt.err (!%p941_p3)
}
 0x193   : > { %783 = dma.vmem_to_hbm [thread:$0]  (%p1334_p11), %s1269_s26, 256, %s1267_s7, %s650_s25  }
 0x194 PF: > { %s676_s20 = sand.u32 1, %s975_s21   ;;  %p1335_p7 = scmp.ne.s32.totalorder %s1323_s28, 0 }
 0x195   : > { %p1336_p10 = scmp.ge.s32.totalorder %s987_s24, 2  ;;  %s677_s30 = scalar_lea.sflag [#allocation4], %s676_s20 }
 0x197   : > { %p794_p2 = pnand %p1336_p10, %p1335_p7 }
 0x199   : > { %p795_p13 = pneg %p794_p2 }
 0x19b   : > { %970 = dma.done.wait (%p795_p13), %s677_s30, 256  }
 0x19c   : > { %972 = vsyncadd (%p795_p13), %s677_s30, 4294967040  ;;  %p20_p0 = scmp.ge.s32.totalorder %s1095_s9, 4   ;;  %s1337_s21 = smov %s979_s22 }
 0x19d   : > { %s1338_s22 = smov %s983_s23  ;;  %s1339_s23 = smov %s1112_s17 }
 0x19e   : > { %s1340_s24 = smov %s1095_s9  ;;  %22 = sbr.rel (!%p20_p0) target bundleno = 8 (0x8), region = 104 }
 0x1a3   :  { %682 = vsyncpa [#allocation3], 1 }
 0x1a4   :  { %684 = vsyncpa [#allocation3 + $0x1], 1 }
 0x1a5   :  { %685 = vsyncpa [#allocation6], 1 }
 0x1a6   :  { %686 = vsyncpa [#allocation4], 1 }
 0x1a7   :  { %688 = vsyncpa [#allocation4 + $0x1], 1 }

</bundles_post_ra>
